<compile_context>
chip_gen: v7x
topology: tpu7x:2x2x1
jax: 0.10.0
libtpu: 0.0.40
codegen_flags: <defaults>
</compile_context>

<pallas_src>
import functools

import jax
import jax.numpy as jnp
import numpy as np
from jax import lax
from jax.experimental import pallas as pl
from jax.experimental.pallas import tpu as pltpu


def _round_up(x, m):
    return (x + m - 1) // m * m


def _schedule_kernel(starts_ref, items_ref, out_ref, *, group):
    """One grid step == one (row_tile, n_samples) slab of flattened rows.

    starts_ref : VMEM (row_tile, 1) int32   per-row shift amounts
    items_ref  : VMEM (row_tile, n_samples)
    out_ref    : VMEM (row_tile, n_samples)
    """
    rows, n = out_ref.shape
    n_groups = rows // group

    # Hoisted once per grid step (JAX does not CSE broadcast_in_dim).
    t_idx = lax.broadcasted_iota(jnp.int32, (group, n), 1)
    zero = jnp.zeros((), out_ref.dtype)

    def process_group(g):
        r0 = g * group
        if not isinstance(r0, int):
            r0 = pl.multiple_of(r0, group)            # aligned dense slices
        x = items_ref[pl.ds(r0, group), :]            # dense (group, n) load
        s = starts_ref[pl.ds(r0, group), :]           # (group, 1) int32

        # Per-row right-rotation by s via a barrel shifter: for each bit of
        # the shift, roll the whole dense slab (XLU) and select per row (VPU).
        shift = 1
        while shift < n:
            rolled = pltpu.roll(x, shift, axis=1)
            x = jnp.where((s & shift) != 0, rolled, x)
            shift <<= 1

        # Prefix-zero mask fused into the single dense store (t < start -> 0).
        out_ref[pl.ds(r0, group), :] = jnp.where(t_idx >= s, x, zero)

    if n_groups <= 8:
        # Small, fully unrolled — LLO scheduler visibility, tiny live ranges.
        for g in range(n_groups):
            process_group(g)
    else:
        unroll = 1
        for u in (8, 4, 2):
            if n_groups % u == 0:
                unroll = u
                break

        def body(g, carry):
            process_group(g)
            return carry

        lax.fori_loop(0, n_groups, body, 0, unroll=unroll)


def _tpu_config():
    """Best-effort (vmem_capacity_bytes, num_tensorcores); conservative fallback."""
    vmem_bytes = 64 * 1024 * 1024   # v7x-sized fallback => safe budgets anywhere
    n_cores = 1
    try:
        info = pltpu.get_tpu_info()
        vmem_bytes = int(getattr(info, "vmem_capacity_bytes", vmem_bytes))
        for name in ("num_cores", "tensorcore_count", "core_count", "num_tensorcores"):
            val = getattr(info, name, None)
            if val:
                n_cores = int(val)
                break
    except Exception:
        pass
    try:
        kind = jax.devices()[0].device_kind.lower()
        if "7" in kind:                 # v7x: 2 TensorCores per chip
            n_cores = max(n_cores, 2)
    except Exception:
        pass
    return vmem_bytes, n_cores


def _choose_row_tile(n_rows, n_samples, itemsize, sub, tile_budget, multi_core):
    r_up = _round_up(n_rows, sub)
    row_bytes = max(1, n_samples * itemsize)
    by_budget = max(sub, (tile_budget // row_bytes) // sub * sub)
    tile = min(r_up, by_budget)
    # Only on multi-TensorCore chips (v7x) keep >= 2 grid steps so the
    # ("parallel",) axis can shard across cores; on 1-TC chips the grid is a
    # sequential loop and splitting only doubles per-step overhead.
    if multi_core and tile >= r_up and r_up >= 2 * sub:
        tile = max(sub, (r_up // 2) // sub * sub)
    return tile


def atom_scheduler(items, positions, targets=None):
    """Pallas implementation of AtomScheduler.forward (Position.forward)."""
    del targets  # consumed only by the custom backward, not by the forward pass
    if positions.ndim != 2:
        raise ValueError("positions should be (batch, n_clips)")
    batch, n_clips = positions.shape
    n_samples = items.shape[-1]
    items = items.reshape(-1, n_clips, n_samples)
    if items.shape[0] == 1 and batch > 1:          # reference broadcast case
        items = jnp.broadcast_to(items, (batch, n_clips, n_samples))
    assert items.shape[0] == batch

    n_rows = batch * n_clips
    items_flat = items.reshape(n_rows, n_samples)

    # start = int(pos * n_samples), truncation toward zero like torch .long().
    # Clamp so out-of-range positions degrade to shift-and-zero-pad.
    starts = (positions.reshape(n_rows) * n_samples).astype(jnp.int32)
    starts = jnp.clip(starts, 0, n_samples).reshape(n_rows, 1)

    itemsize = jnp.dtype(items.dtype).itemsize
    sub = 8 * max(1, 4 // itemsize)        # sublane granularity: 8 / 16 / 32

    vmem_bytes, n_cores = _tpu_config()
    if vmem_bytes <= 64 * 1024 * 1024:     # v7x-class (64 MiB VMEM / TC)
        tile_budget, vmem_limit = 4 * 1024 * 1024, 32 * 1024 * 1024
    else:                                  # v5e / v6e (128 MiB VMEM)
        tile_budget, vmem_limit = 8 * 1024 * 1024, 64 * 1024 * 1024

    row_tile = _choose_row_tile(n_rows, n_samples, itemsize, sub,
                                tile_budget, n_cores >= 2)
    grid = (pl.cdiv(n_rows, row_tile),)    # no wrapper-side jnp.pad of items

    out_flat = pl.pallas_call(
        functools.partial(_schedule_kernel, group=sub),
        out_shape=jax.ShapeDtypeStruct((n_rows, n_samples), items.dtype),
        grid=grid,
        in_specs=[
            pl.BlockSpec((row_tile, 1), lambda i: (i, 0)),           # shifts
            pl.BlockSpec((row_tile, n_samples), lambda i: (i, 0)),   # item rows
        ],
        out_specs=pl.BlockSpec((row_tile, n_samples), lambda i: (i, 0)),
        compiler_params=pltpu.CompilerParams(
            dimension_semantics=("parallel",),
            vmem_limit_bytes=vmem_limit,
        ),
    )(starts, items_flat)

    return out_flat.reshape(batch, n_clips, n_samples)


def _reference(items, positions):
    """Pure-JAX reference of position(positions, items, n_samples)."""
    b, c, n = items.shape
    starts = (positions * n).astype(jnp.int32)                  # (b, c)
    t = jnp.arange(n, dtype=jnp.int32)[None, None, :]           # (1, 1, n)
    src = t - starts[:, :, None]                                # (b, c, n)
    valid = src >= 0
    gathered = jnp.take_along_axis(items, jnp.clip(src, 0, n - 1), axis=-1)
    return jnp.where(valid, gathered, jnp.zeros_like(gathered))


if __name__ == "__main__":
    key = jax.random.PRNGKey(0)
    k_items, k_pos, k_tgt = jax.random.split(key, 3)

    # Case 1: typical module shapes (rows exactly fill one sublane-dense group).
    batch, n_clips, n_samples = 2, 4, 256
    items = jax.random.normal(k_items, (batch, n_clips, n_samples), jnp.float32)
    positions = jax.random.uniform(k_pos, (batch, n_clips), jnp.float32)     # [0, 1)
    targets = jax.random.normal(k_tgt, (batch, 1, n_samples), jnp.float32)   # unused fwd
    out = jax.block_until_ready(atom_scheduler(items, positions, targets))
    np.testing.assert_allclose(
        np.asarray(out), np.asarray(_reference(items, positions)), atol=1e-6)

    # Case 2: rows not a multiple of the sublane group (partial last block, no pad).
    k_items2, k_pos2 = jax.random.split(jax.random.PRNGKey(1), 2)
    batch2, n_clips2, n_samples2 = 3, 5, 384
    items2 = jax.random.normal(k_items2, (batch2, n_clips2, n_samples2), jnp.float32)
    positions2 = jax.random.uniform(k_pos2, (batch2, n_clips2), jnp.float32)
    out2 = jax.block_until_ready(atom_scheduler(items2, positions2, None))
    np.testing.assert_allclose(
        np.asarray(out2), np.asarray(_reference(items2, positions2)), atol=1e-6)

    # Case 3: enough rows to exercise the in-kernel fori_loop over row groups.
    k_items3, k_pos3 = jax.random.split(jax.random.PRNGKey(2), 2)
    batch3, n_clips3, n_samples3 = 2, 128, 128
    items3 = jax.random.normal(k_items3, (batch3, n_clips3, n_samples3), jnp.float32)
    positions3 = jax.random.uniform(k_pos3, (batch3, n_clips3), jnp.float32)
    out3 = jax.block_until_ready(atom_scheduler(items3, positions3, None))
    np.testing.assert_allclose(
        np.asarray(out3), np.asarray(_reference(items3, positions3)), atol=1e-6)

    print("KERNEL_OK")
</pallas_src>

<mosaic_0001>
module attributes {stable_mosaic.version = 11 : i64} {
  func.func @_schedule_kernel(%arg0: i32, %arg1: memref<8x1xi32, #tpu.memory_space<vmem>>, %arg2: memref<8x256xf32, #tpu.memory_space<vmem>>, %arg3: memref<8x256xf32, #tpu.memory_space<vmem>>) attributes {dimension_semantics = [#tpu.dimension_semantics<parallel>], iteration_bounds = array<i64: 1>, scalar_prefetch = 0 : i64, scratch_operands = 0 : i64, tpu.core_type = #tpu.core_type<tc>, window_params = [{transform_indices = @transform_0, window_bounds = array<i64: 8, 1>}, {transform_indices = @transform_1, window_bounds = array<i64: 8, 256>}, {transform_indices = @transform_2, window_bounds = array<i64: 8, 256>}]} {
    %0 = tpu.iota {dimensions = array<i32: 1>} : vector<8x256xi32>
    %c0 = arith.constant 0 : index
    %c0_0 = arith.constant 0 : index
    %1 = vector.load %arg2[%c0, %c0_0] : memref<8x256xf32, #tpu.memory_space<vmem>>, vector<8x256xf32>
    %c0_1 = arith.constant 0 : index
    %c0_2 = arith.constant 0 : index
    %2 = vector.load %arg1[%c0_1, %c0_2] : memref<8x1xi32, #tpu.memory_space<vmem>>, vector<8x1xi32>
    %c1_i32 = arith.constant 1 : i32
    %3 = tpu.dynamic_rotate %1 by %c1_i32 dim 1 : vector<8x256xf32>, i32 -> vector<8x256xf32>
    %c1_i32_3 = arith.constant 1 : i32
    %4 = vector.broadcast %c1_i32_3 : i32 to vector<8x1xi32>
    %5 = arith.andi %2, %4 : vector<8x1xi32>
    %c0_i32 = arith.constant 0 : i32
    %6 = vector.broadcast %c0_i32 : i32 to vector<8x1xi32>
    %7 = arith.cmpi ne, %5, %6 : vector<8x1xi32>
    %8 = vector.shape_cast %7 : vector<8x1xi1> to vector<8x1xi1>
    %9 = vector.broadcast %8 : vector<8x1xi1> to vector<8x256xi1>
    %10 = arith.select %9, %3, %1 : vector<8x256xi1>, vector<8x256xf32>
    %c2_i32 = arith.constant 2 : i32
    %11 = tpu.dynamic_rotate %10 by %c2_i32 dim 1 : vector<8x256xf32>, i32 -> vector<8x256xf32>
    %c2_i32_4 = arith.constant 2 : i32
    %12 = vector.broadcast %c2_i32_4 : i32 to vector<8x1xi32>
    %13 = arith.andi %2, %12 : vector<8x1xi32>
    %c0_i32_5 = arith.constant 0 : i32
    %14 = vector.broadcast %c0_i32_5 : i32 to vector<8x1xi32>
    %15 = arith.cmpi ne, %13, %14 : vector<8x1xi32>
    %16 = vector.shape_cast %15 : vector<8x1xi1> to vector<8x1xi1>
    %17 = vector.broadcast %16 : vector<8x1xi1> to vector<8x256xi1>
    %18 = arith.select %17, %11, %10 : vector<8x256xi1>, vector<8x256xf32>
    %c4_i32 = arith.constant 4 : i32
    %19 = tpu.dynamic_rotate %18 by %c4_i32 dim 1 : vector<8x256xf32>, i32 -> vector<8x256xf32>
    %c4_i32_6 = arith.constant 4 : i32
    %20 = vector.broadcast %c4_i32_6 : i32 to vector<8x1xi32>
    %21 = arith.andi %2, %20 : vector<8x1xi32>
    %c0_i32_7 = arith.constant 0 : i32
    %22 = vector.broadcast %c0_i32_7 : i32 to vector<8x1xi32>
    %23 = arith.cmpi ne, %21, %22 : vector<8x1xi32>
    %24 = vector.shape_cast %23 : vector<8x1xi1> to vector<8x1xi1>
    %25 = vector.broadcast %24 : vector<8x1xi1> to vector<8x256xi1>
    %26 = arith.select %25, %19, %18 : vector<8x256xi1>, vector<8x256xf32>
    %c8_i32 = arith.constant 8 : i32
    %27 = tpu.dynamic_rotate %26 by %c8_i32 dim 1 : vector<8x256xf32>, i32 -> vector<8x256xf32>
    %c8_i32_8 = arith.constant 8 : i32
    %28 = vector.broadcast %c8_i32_8 : i32 to vector<8x1xi32>
    %29 = arith.andi %2, %28 : vector<8x1xi32>
    %c0_i32_9 = arith.constant 0 : i32
    %30 = vector.broadcast %c0_i32_9 : i32 to vector<8x1xi32>
    %31 = arith.cmpi ne, %29, %30 : vector<8x1xi32>
    %32 = vector.shape_cast %31 : vector<8x1xi1> to vector<8x1xi1>
    %33 = vector.broadcast %32 : vector<8x1xi1> to vector<8x256xi1>
    %34 = arith.select %33, %27, %26 : vector<8x256xi1>, vector<8x256xf32>
    %c16_i32 = arith.constant 16 : i32
    %35 = tpu.dynamic_rotate %34 by %c16_i32 dim 1 : vector<8x256xf32>, i32 -> vector<8x256xf32>
    %c16_i32_10 = arith.constant 16 : i32
    %36 = vector.broadcast %c16_i32_10 : i32 to vector<8x1xi32>
    %37 = arith.andi %2, %36 : vector<8x1xi32>
    %c0_i32_11 = arith.constant 0 : i32
    %38 = vector.broadcast %c0_i32_11 : i32 to vector<8x1xi32>
    %39 = arith.cmpi ne, %37, %38 : vector<8x1xi32>
    %40 = vector.shape_cast %39 : vector<8x1xi1> to vector<8x1xi1>
    %41 = vector.broadcast %40 : vector<8x1xi1> to vector<8x256xi1>
    %42 = arith.select %41, %35, %34 : vector<8x256xi1>, vector<8x256xf32>
    %c32_i32 = arith.constant 32 : i32
    %43 = tpu.dynamic_rotate %42 by %c32_i32 dim 1 : vector<8x256xf32>, i32 -> vector<8x256xf32>
    %c32_i32_12 = arith.constant 32 : i32
    %44 = vector.broadcast %c32_i32_12 : i32 to vector<8x1xi32>
    %45 = arith.andi %2, %44 : vector<8x1xi32>
    %c0_i32_13 = arith.constant 0 : i32
    %46 = vector.broadcast %c0_i32_13 : i32 to vector<8x1xi32>
    %47 = arith.cmpi ne, %45, %46 : vector<8x1xi32>
    %48 = vector.shape_cast %47 : vector<8x1xi1> to vector<8x1xi1>
    %49 = vector.broadcast %48 : vector<8x1xi1> to vector<8x256xi1>
    %50 = arith.select %49, %43, %42 : vector<8x256xi1>, vector<8x256xf32>
    %c64_i32 = arith.constant 64 : i32
    %51 = tpu.dynamic_rotate %50 by %c64_i32 dim 1 : vector<8x256xf32>, i32 -> vector<8x256xf32>
    %c64_i32_14 = arith.constant 64 : i32
    %52 = vector.broadcast %c64_i32_14 : i32 to vector<8x1xi32>
    %53 = arith.andi %2, %52 : vector<8x1xi32>
    %c0_i32_15 = arith.constant 0 : i32
    %54 = vector.broadcast %c0_i32_15 : i32 to vector<8x1xi32>
    %55 = arith.cmpi ne, %53, %54 : vector<8x1xi32>
    %56 = vector.shape_cast %55 : vector<8x1xi1> to vector<8x1xi1>
    %57 = vector.broadcast %56 : vector<8x1xi1> to vector<8x256xi1>
    %58 = arith.select %57, %51, %50 : vector<8x256xi1>, vector<8x256xf32>
    %c128_i32 = arith.constant 128 : i32
    %59 = tpu.dynamic_rotate %58 by %c128_i32 dim 1 : vector<8x256xf32>, i32 -> vector<8x256xf32>
    %c128_i32_16 = arith.constant 128 : i32
    %60 = vector.broadcast %c128_i32_16 : i32 to vector<8x1xi32>
    %61 = arith.andi %2, %60 : vector<8x1xi32>
    %c0_i32_17 = arith.constant 0 : i32
    %62 = vector.broadcast %c0_i32_17 : i32 to vector<8x1xi32>
    %63 = arith.cmpi ne, %61, %62 : vector<8x1xi32>
    %64 = vector.shape_cast %63 : vector<8x1xi1> to vector<8x1xi1>
    %65 = vector.broadcast %64 : vector<8x1xi1> to vector<8x256xi1>
    %66 = arith.select %65, %59, %58 : vector<8x256xi1>, vector<8x256xf32>
    %67 = vector.broadcast %2 : vector<8x1xi32> to vector<8x256xi32>
    %68 = arith.cmpi sge, %0, %67 : vector<8x256xi32>
    %cst = arith.constant 0.000000e+00 : f32
    %69 = vector.broadcast %cst : f32 to vector<8x256xf32>
    %70 = arith.select %68, %66, %69 : vector<8x256xi1>, vector<8x256xf32>
    %c0_18 = arith.constant 0 : index
    %c0_19 = arith.constant 0 : index
    %71 = vector.load %arg3[%c0_18, %c0_19] : memref<8x256xf32, #tpu.memory_space<vmem>>, vector<8x256xf32>
    tpu.vector_store %arg3[%c0_18, %c0_19], %70 {strides = array<i32>} : memref<8x256xf32, #tpu.memory_space<vmem>>, vector<8x256xf32>,
    return
  }
  func.func @transform_0(%arg0: i32) -> (i32, i32) {
    %c0_i32 = arith.constant 0 : i32
    %c0_i32_0 = arith.constant 0 : i32
    return %arg0, %c0_i32 : i32, i32
  }
  func.func @transform_1(%arg0: i32) -> (i32, i32) {
    %c0_i32 = arith.constant 0 : i32
    %c0_i32_0 = arith.constant 0 : i32
    return %arg0, %c0_i32 : i32, i32
  }
  func.func @transform_2(%arg0: i32) -> (i32, i32) {
    %c0_i32 = arith.constant 0 : i32
    %c0_i32_0 = arith.constant 0 : i32
    return %arg0, %c0_i32 : i32, i32
  }
}

</mosaic_0001>

<bundles_post_ra>
// kernel: tpu_custom_call.1
= control target key start
LH: loop header
LB: loop body
LE: loop exit
PB: predicated region body
PF: predicated region fallthrough
CT: control target
= control target key end

     0   :  { %7 = vsyncpa [#allocation3], 0  ;;  %s319_s0 = inlined_call_operand.vmem [shape: s32[8,1], index: 0, kind: input, shape index: {}]   ;;  %s320_s1 = inlined_call_operand.hbm [shape: f32[8,256], index: 1, kind: input, shape index: {}]   ;;  %s321_s2 = inlined_call_operand.hbm [shape: f32[8,256], index: 2, kind: output, shape index: {}]  }
   0x1   :  { %8 = vsyncpa [#allocation4], 0  ;;  %s235_s9 = smov [#allocation2]   ;;  %s187_s13 = scalar_lea.hbm %s320_s1, 256 }
   0x2   :  { %s17_s10 = sshll.u32 %s235_s9, 4  ;;  %p188_p0 = scmp.ne.s32.totalorder %s320_s1, %s187_s13  ;;  %s18_s10 = int_to_ptr.vmem [resolvable:$true] %s17_s10 }
   0x3   :  { %p191_p1 = scmp.lt.u32.totalorder %s187_s13, %s320_s1 }
   0x5   :  { %p193_p2 = pnand %p191_p1, %p188_p0 }
   0x7   :  { %196 = shalt.err (!%p193_p2)
}
   0x8   :  { %s197_s18 = scalar_lea.vmem %s18_s10, 256  ;;  %p202_p4 = scmp.lt.s32.totalorder %s18_s10, %s18_s10 }
   0x9   :  { %p198_p3 = scmp.ne.s32.totalorder %s18_s10, %s197_s18  ;;  %p203_p5 = scmp.lt.s32.totalorder %s197_s18, %s197_s18 }
   0xb   :  { %p204_p6 = por %p203_p5, %p202_p4 }
   0xd   :  { %p205_p7 = pnand %p204_p6, %p198_p3 }
   0xf   :  { %208 = shalt.err (!%p205_p7)
}
  0x10   :  { %20 = dma.hbm_to_vmem [thread:$0]  %s320_s1, 256, %s18_s10, [#allocation3]  }
  0x11   :  { %231 = dma.done.wait [#allocation3], 256  }
  0x12   :  { %232 = vsyncadd [#allocation3], 4294967040  ;;  %v236_v0 = vmov 0   ;;  %v277_v1 = vld [vmem:[%s319_s0] sm:$0xff]  ;;  %v28_v2 = vld [vmem:[#allocation2 + $0x8] sm:$0xff]  ;;  %s237_s23 = smov 1   ;;  %v24_v8 = vlaneseq }
  0x13   :  { %185 = vset.pattern.permute.xlu0 %v236_v0  ;;  %186 = vset.pattern.permute.xlu1 %v236_v0  ;;  %v37_v3 = vand.u32 1, %v277_v1  ;;  %v53_v4 = vand.u32 2, %v277_v1  ;;  %v27_v7 = vld [vmem:[#allocation2] sm:$0xff]  ;;  %v69_v11 = vand.u32 4, %v277_v1  ;;  %s238_s0 = smov 2   ;;  %v85_v20 = vand.u32 8, %v277_v1 }
  0x14   :  { %32 = vrot.lane.b32.xlu1 %v28_v2, %s237_s23  ;;  %v283_v9 = vand.u32 127, %v24_v8  ;;  %s239_s1 = smov 4   ;;  %v101_v29 = vand.u32 16, %v277_v1  ;;  %s240_s24 = smov 8   ;;  %v117_v38 = vand.u32 32, %v277_v1  ;;  %v133_v47 = vand.u32 64, %v277_v1 }
  0x15   :  { %vm38_vm0 = vcmp.ne.s32.totalorder %v37_v3, 0  ;;  %vm54_vm1 = vcmp.ne.s32.totalorder %v53_v4, 0  ;;  %vm70_vm4 = vcmp.ne.s32.totalorder %v69_v11, 0  ;;  %vm86_vm7 = vcmp.ne.s32.totalorder %v85_v20, 0  ;;  %s241_s25 = smov 16   ;;  %s242_s26 = smov 32  }
  0x16   :  { %v39_v5 = vsel %vm38_vm0, 1, %v236_v0  ;;  %v55_v6 = vsel %vm54_vm1, 1, %v236_v0  ;;  %vm34_vm2 = vcmp.lt.s32.totalorder %v283_v9, 1  ;;  %v71_v18 = vsel %vm70_vm4, 1, %v236_v0  ;;  %s243_s27 = smov 64   ;;  %s244_s28 = smov [#allocation5]  }
  0x17   :  { %41 = vperm.xlu0 %185, %v39_v5   ;;  %vm50_vm5 = vcmp.lt.s32.totalorder %v283_v9, 2  ;;  %v87_v27 = vsel %vm86_vm7, 1, %v236_v0  ;;  %vm66_vm8 = vcmp.lt.s32.totalorder %v283_v9, 4  ;;  %vm102_vm10 = vcmp.ne.s32.totalorder %v101_v29, 0  ;;  %s166_s29 = sshll.u32 %s244_s28, 4  ;;  %s167_s29 = int_to_ptr.vmem [resolvable:$true] %s166_s29 }
  0x18   :  { %57 = vperm.xlu1 %186, %v55_v6   ;;  %v103_v36 = vsel %vm102_vm10, 1, %v236_v0  ;;  %vm82_vm11 = vcmp.lt.s32.totalorder %v283_v9, 8  ;;  %vm118_vm13 = vcmp.ne.s32.totalorder %v117_v38, 0  ;;  %v142_v48 = vand.u32 128, %v277_v1  ;;  %s209_s30 = scalar_lea.vmem %s167_s29, 256  ;;  %p214_p9 = scmp.lt.s32.totalorder %s167_s29, %s167_s29 }
  0x19   :  { %v119_v45 = vsel %vm118_vm13, 1, %v236_v0  ;;  %vm98_vm14 = vcmp.lt.s32.totalorder %v283_v9, 16  ;;  %vm134_vm15 = vcmp.ne.s32.totalorder %v133_v47, 0  ;;  %vm130_vm4 = vcmp.lt.s32.totalorder %v283_v9, 64  ;;  %p210_p8 = scmp.ne.s32.totalorder %s167_s29, %s209_s30  ;;  %p215_p10 = scmp.lt.s32.totalorder %s209_s30, %s209_s30 }
  0x1a   :  { %vm143_vm1 = vcmp.ne.s32.totalorder %v142_v48, 0  ;;  %v135_v55 = vsel %vm134_vm15, 1, %v236_v0 }
  0x1b   :  { %30 = vrot.lane.b32.xlu0 %v27_v7, %s237_s23  ;;  %v144_v56 = vsel %vm143_vm1, 1, %v236_v0  ;;  %p216_p11 = por %p215_p10, %p214_p9 }
  0x1d   :  { %p217_p12 = pnand %p216_p11, %p210_p8 }
  0x86   :  { %v33_v12 = vpop.permute.xlu1 %32 }
  0x96   :  { %v42_v10 = vpop.permute.xlu0 %41 }
  0x97   :  { %vm43_vm3 = vcmp.eq.s32.totalorder %v42_v10, 1  ;;  %v58_v19 = vpop.permute.xlu1 %57 }
  0x98   :  { %vm59_vm6 = vcmp.eq.s32.totalorder %v58_v19, 1 }
  0x9a   :  { %v31_v13 = vpop.permute.xlu0 %30 }
  0x9b   :  { %v35_v14 = vsel %vm34_vm2, %v31_v13, %v33_v12  ;;  %v36_v15 = vsel %vm34_vm2, %v33_v12, %v31_v13  ;;  %vm114_vm2 = vcmp.lt.s32.totalorder %v283_v9, 32 }
  0x9c   :  { %v44_v16 = vsel %vm43_vm3, %v36_v15, %v27_v7  ;;  %v45_v17 = vsel %vm43_vm3, %v35_v14, %v28_v2 }
  0x9d   :  { %46 = vrot.lane.b32.xlu0 %v44_v16, %s238_s0  ;;  %48 = vrot.lane.b32.xlu1 %v45_v17, %s238_s0 }
  0xa1   :  { %73 = vperm.xlu0 %185, %v71_v18  }
 0x10f   :  { %v47_v21 = vpop.permute.xlu0 %46  ;;  %v49_v22 = vpop.permute.xlu1 %48 }
 0x110   :  { %v51_v23 = vsel %vm50_vm5, %v47_v21, %v49_v22  ;;  %v52_v24 = vsel %vm50_vm5, %v49_v22, %v47_v21 }
 0x111   :  { %v60_v25 = vsel %vm59_vm6, %v52_v24, %v44_v16  ;;  %v61_v26 = vsel %vm59_vm6, %v51_v23, %v45_v17 }
 0x112   :  { %62 = vrot.lane.b32.xlu1 %v60_v25, %s239_s1  ;;  %64 = vrot.lane.b32.xlu0 %v61_v26, %s239_s1 }
 0x116   :  { %89 = vperm.xlu1 %186, %v87_v27  }
 0x120   :  { %v74_v28 = vpop.permute.xlu0 %73 }
 0x121   :  { %vm75_vm9 = vcmp.eq.s32.totalorder %v74_v28, 1 }
 0x184   :  { %v63_v30 = vpop.permute.xlu1 %62  ;;  %v65_v31 = vpop.permute.xlu0 %64 }
 0x185   :  { %v67_v32 = vsel %vm66_vm8, %v63_v30, %v65_v31  ;;  %v68_v33 = vsel %vm66_vm8, %v65_v31, %v63_v30 }
 0x186   :  { %v76_v34 = vsel %vm75_vm9, %v68_v33, %v60_v25  ;;  %v77_v35 = vsel %vm75_vm9, %v67_v32, %v61_v26 }
 0x187   :  { %78 = vrot.lane.b32.xlu0 %v76_v34, %s240_s24  ;;  %80 = vrot.lane.b32.xlu1 %v77_v35, %s240_s24 }
 0x18b   :  { %105 = vperm.xlu0 %185, %v103_v36  }
 0x195   :  { %v90_v37 = vpop.permute.xlu1 %89 }
 0x196   :  { %vm91_vm12 = vcmp.eq.s32.totalorder %v90_v37, 1 }
 0x1f9   :  { %v79_v39 = vpop.permute.xlu0 %78  ;;  %v81_v40 = vpop.permute.xlu1 %80 }
 0x1fa   :  { %v83_v41 = vsel %vm82_vm11, %v79_v39, %v81_v40  ;;  %v84_v42 = vsel %vm82_vm11, %v81_v40, %v79_v39 }
 0x1fb   :  { %v92_v43 = vsel %vm91_vm12, %v84_v42, %v76_v34  ;;  %v93_v44 = vsel %vm91_vm12, %v83_v41, %v77_v35 }
 0x1fc   :  { %94 = vrot.lane.b32.xlu1 %v92_v43, %s241_s25  ;;  %96 = vrot.lane.b32.xlu0 %v93_v44, %s241_s25 }
 0x200   :  { %121 = vperm.xlu1 %186, %v119_v45  }
 0x20a   :  { %v106_v46 = vpop.permute.xlu0 %105 }
 0x20b   :  { %vm107_vm0 = vcmp.eq.s32.totalorder %v106_v46, 1 }
 0x26e   :  { %v95_v49 = vpop.permute.xlu1 %94  ;;  %v97_v50 = vpop.permute.xlu0 %96 }
 0x26f   :  { %v99_v51 = vsel %vm98_vm14, %v95_v49, %v97_v50  ;;  %v100_v52 = vsel %vm98_vm14, %v97_v50, %v95_v49 }
 0x270   :  { %v108_v53 = vsel %vm107_vm0, %v100_v52, %v92_v43  ;;  %v109_v54 = vsel %vm107_vm0, %v99_v51, %v93_v44 }
 0x271   :  { %110 = vrot.lane.b32.xlu0 %v108_v53, %s242_s26  ;;  %112 = vrot.lane.b32.xlu1 %v109_v54, %s242_s26 }
 0x275   :  { %137 = vperm.xlu0 %185, %v135_v55   ;;  %146 = vperm.xlu1 %186, %v144_v56  }
 0x279   :  { %152 = vperm.xlu0 %185, %v277_v1   ;;  %v26_v1 = vadd.s32 128, %v283_v9 }
 0x27f   :  { %v122_v57 = vpop.permute.xlu1 %121 }
 0x280   :  { %vm123_vm3 = vcmp.eq.s32.totalorder %v122_v57, 1 }
 0x2e3   :  { %v111_v58 = vpop.permute.xlu0 %110  ;;  %v113_v59 = vpop.permute.xlu1 %112 }
 0x2e4   :  { %v115_v60 = vsel %vm114_vm2, %v111_v58, %v113_v59  ;;  %v116_v61 = vsel %vm114_vm2, %v113_v59, %v111_v58 }
 0x2e5   :  { %v124_v62 = vsel %vm123_vm3, %v116_v61, %v108_v53  ;;  %v125_v63 = vsel %vm123_vm3, %v115_v60, %v109_v54 }
 0x2e6   :  { %126 = vrot.lane.b32.xlu1 %v124_v62, %s243_s27  ;;  %128 = vrot.lane.b32.xlu0 %v125_v63, %s243_s27 }
 0x2f4   :  { %v138_v2 = vpop.permute.xlu0 %137  ;;  %v147_v3 = vpop.permute.xlu1 %146 }
 0x2f5   :  { %vm139_vm5 = vcmp.eq.s32.totalorder %v138_v2, 1  ;;  %vm148_vm6 = vcmp.eq.s32.totalorder %v147_v3, 1 }
 0x2f8   :  { %v153_v0 = vpop.permute.xlu0 %152 }
 0x2f9   :  { %vm154_vm7 = vcmp.ge.s32.totalorder %v283_v9, %v153_v0  ;;  %vm155_vm8 = vcmp.ge.s32.totalorder %v26_v1, %v153_v0 }
 0x358   :  { %v129_v4 = vpop.permute.xlu0 %128  ;;  %v127_v5 = vpop.permute.xlu1 %126 }
 0x359   :  { %v131_v6 = vsel %vm130_vm4, %v127_v5, %v129_v4  ;;  %v132_v7 = vsel %vm130_vm4, %v129_v4, %v127_v5 }
 0x35a   :  { %v140_v8 = vsel %vm139_vm5, %v132_v7, %v124_v62  ;;  %v141_v10 = vsel %vm139_vm5, %v131_v6, %v125_v63 }
 0x35b   :  { %v149_v11 = vsel %vm148_vm6, %v141_v10, %v140_v8  ;;  %v150_v12 = vsel %vm148_vm6, %v140_v8, %v141_v10 }
 0x35c   :  { %v156_v13 = vsel %vm154_vm7, %v149_v11, 0.0  ;;  %v157_v14 = vsel %vm155_vm8, %v150_v12, 0.0 }
 0x35d   :  { %158 = vst [vmem:[#allocation5] sm:$0xff] %v156_v13  ;;  %159 = vst [vmem:[#allocation5 + $0x8] sm:$0xff] %v157_v14 }
 0x35e   :  { %220 = shalt.err (!%p217_p12)
}
 0x35f   :  { %s221_s5 = scalar_lea.hbm %s321_s2, 256 }
 0x360   :  { %p222_p13 = scmp.ne.s32.totalorder %s321_s2, %s221_s5  ;;  %p225_p0 = scmp.lt.u32.totalorder %s221_s5, %s321_s2 }
 0x362   :  { %p227_p1 = pnand %p225_p0, %p222_p13 }
 0x364   :  { %230 = shalt.err (!%p227_p1)
}
 0x365   :  { %169 = dma.vmem_to_hbm [thread:$0]  %s167_s29, 256, %s321_s2, [#allocation4]  }
 0x366   :  { %233 = dma.done.wait [#allocation4], 256  }
 0x367   :  { %234 = vsyncadd [#allocation4], 4294967040 }
 0x368   :  { %173 = vsyncpa [#allocation3], 1 }
 0x369   :  { %174 = vsyncpa [#allocation4], 1 }

</bundles_post_ra>
